<compile_context>
chip_gen: v7x
topology: tpu7x:2x2x1
jax: 0.10.0
libtpu: 0.0.40
codegen_flags: <defaults>
</compile_context>

<pallas_src>
import functools
import math

import jax
import jax.numpy as jnp
from jax.experimental import pallas as pl
from jax.experimental.pallas import tpu as pltpu


_LANE = 128
_TM = 256  # adj row-slab height


def _round_up(x, m):
    return ((x + m - 1) // m) * m


def _pad2(a, rows, cols, dtype):
    a = a.astype(dtype)
    r, c = a.shape
    if r == rows and c == cols:
        return a
    return jnp.pad(a, ((0, rows - r), (0, cols - c)))


@functools.lru_cache(maxsize=None)
def _vmem_budgets():
    """Generation-aware VMEM budgets.

    Returns (vmem_limit_bytes for Mosaic, working-set budget for our gating).
    ~85% / ~75% of physical VMEM: ~109/96 MiB on v5e/v6e (128 MiB),
    ~54/48 MiB on v7x (64 MiB per TensorCore), leaving headroom for Mosaic
    internal scratch, semaphores and pipeline bookkeeping.
    """
    try:
        phys = int(pltpu.get_tpu_info().vmem_capacity_bytes)
    except Exception:  # unknown part -> conservative default that fits v7x
        phys = 64 * 1024 * 1024
    return int(phys * 0.85), int(phys * 0.75)


# ---------------------------------------------------------------------------
# Fused kernel: out = adj @ (x @ W), with `support` kept VMEM-resident.
# ---------------------------------------------------------------------------
def _fused_gcn_kernel(x_hbm, w_hbm, adj_ref, o_ref, x_vmem, w_vmem, support_ref, sem):
    # Grid = (row_groups, slabs_per_group).  The group axis is "parallel"
    # (sharded across TensorCores on dual-TC parts such as v7x); the slab axis
    # is "arbitrary" so the per-core support scratch computed at slab 0 stays
    # valid for every later slab of that group.
    @pl.when(pl.program_id(1) == 0)
    def _():
        # x and W are fetched exactly once per core via manual DMA into
        # single-buffered VMEM scratch (no BlockSpec double-buffering).
        cx = pltpu.make_async_copy(x_hbm, x_vmem, sem.at[0])
        cw = pltpu.make_async_copy(w_hbm, w_vmem, sem.at[1])
        cx.start()
        cw.start()
        cx.wait()
        cw.wait()
        support_ref[...] = jnp.dot(
            x_vmem[...], w_vmem[...], preferred_element_type=jnp.float32
        ).astype(support_ref.dtype)

    # Full reduction in one MXU dot per adj row slab -> straight to o_ref.
    o_ref[...] = jnp.dot(
        adj_ref[...], support_ref[...], preferred_element_type=jnp.float32
    ).astype(o_ref.dtype)


def _fused_gcn(x_p, w_p, adj_p, tm, n_groups, vmem_limit):
    n_pad, fi_pad = x_p.shape
    fo_pad = w_p.shape[1]
    cdtype = x_p.dtype
    itemsize = jnp.dtype(cdtype).itemsize
    spg = n_pad // (n_groups * tm)  # slabs per group
    grid = (n_groups, spg)

    flops = 2 * n_groups * n_pad * fi_pad * fo_pad + 2 * n_pad * n_pad * fo_pad
    bytes_accessed = itemsize * (
        n_groups * (n_pad * fi_pad + fi_pad * fo_pad) + n_pad * n_pad
    ) + 4 * n_pad * fo_pad

    return pl.pallas_call(
        _fused_gcn_kernel,
        out_shape=jax.ShapeDtypeStruct((n_pad, fo_pad), jnp.float32),
        grid_spec=pltpu.PrefetchScalarGridSpec(
            num_scalar_prefetch=0,
            grid=grid,
            in_specs=[
                # x, W: raw HBM refs; DMA'd once per core (single-buffered).
                pl.BlockSpec(memory_space=pl.ANY),
                pl.BlockSpec(memory_space=pl.ANY),
                # adj: one (tm, N) row slab per grid step, touched exactly once.
                pl.BlockSpec((tm, n_pad), lambda g, i: (g * spg + i, 0)),
            ],
            out_specs=pl.BlockSpec((tm, fo_pad), lambda g, i: (g * spg + i, 0)),
            scratch_shapes=[
                pltpu.VMEM((n_pad, fi_pad), cdtype),   # x (resident)
                pltpu.VMEM((fi_pad, fo_pad), cdtype),  # W (resident)
                pltpu.VMEM((n_pad, fo_pad), cdtype),   # support (resident)
                pltpu.SemaphoreType.DMA((2,)),
            ],
        ),
        compiler_params=pltpu.CompilerParams(
            dimension_semantics=("parallel", "arbitrary"),
            vmem_limit_bytes=vmem_limit,
        ),
        cost_estimate=pl.CostEstimate(
            flops=flops, transcendentals=0, bytes_accessed=bytes_accessed
        ),
    )(x_p, w_p, adj_p)


# ---------------------------------------------------------------------------
# Fallback 1: generic tiled MXU matmul (direct o_ref accumulation over K).
# ---------------------------------------------------------------------------
def _tiled_matmul_kernel(a_ref, b_ref, o_ref):
    @pl.when(pl.program_id(2) == 0)
    def _():
        o_ref[...] = jnp.zeros_like(o_ref)

    # Output tile stays VMEM-resident across the K sweep; accumulate in f32.
    o_ref[...] += jnp.dot(a_ref[...], b_ref[...], preferred_element_type=jnp.float32)


def pallas_matmul(a, b, *, compute_dtype=jnp.float32, tm=_TM, tn=256):
    """C = A @ B with f32 accumulation / f32 output; MXU operands in compute_dtype."""
    vmem_limit, budget = _vmem_budgets()
    m, k = a.shape
    k2, n = b.shape
    assert k == k2, f"inner dims mismatch: {k} vs {k2}"
    itemsize = jnp.dtype(compute_dtype).itemsize

    mp = _round_up(m, tm)
    np_ = _round_up(n, tn)
    kp = _round_up(k, _LANE)
    # Largest K slab that divides the padded K and fits the working set
    # (double-buffered A/B tiles + resident f32 output tile).
    tk = _LANE
    for cand in (2048, 1024, 512, 256):
        ws = itemsize * 2 * (tm * cand + cand * tn) + 4 * 2 * tm * tn
        if kp % cand == 0 and ws <= budget:
            tk = cand
            break

    a_p = _pad2(a, mp, kp, compute_dtype)
    b_p = _pad2(b, kp, np_, compute_dtype)

    grid = (mp // tm, np_ // tn, kp // tk)
    out = pl.pallas_call(
        _tiled_matmul_kernel,
        out_shape=jax.ShapeDtypeStruct((mp, np_), jnp.float32),
        grid_spec=pltpu.PrefetchScalarGridSpec(
            num_scalar_prefetch=0,
            grid=grid,
            in_specs=[
                pl.BlockSpec((tm, tk), lambda i, j, kk: (i, kk)),
                pl.BlockSpec((tk, tn), lambda i, j, kk: (kk, j)),
            ],
            out_specs=pl.BlockSpec((tm, tn), lambda i, j, kk: (i, j)),
        ),
        compiler_params=pltpu.CompilerParams(
            dimension_semantics=("parallel", "parallel", "arbitrary"),
            vmem_limit_bytes=vmem_limit,
        ),
        cost_estimate=pl.CostEstimate(
            flops=2 * mp * np_ * kp,
            transcendentals=0,
            bytes_accessed=itemsize * (mp * kp + kp * np_) + 4 * mp * np_,
        ),
    )(a_p, b_p)
    return out[:m, :n]


# ---------------------------------------------------------------------------
# Fallback 2 (stage 2 of adj @ support): RHS kept VMEM-resident, LHS streamed
# one row slab per grid step.  No cross-step carry -> fully parallel grid.
# ---------------------------------------------------------------------------
def _resident_rhs_matmul_kernel(a_ref, b_ref, o_ref):
    o_ref[...] = jnp.dot(
        a_ref[...], b_ref[...], preferred_element_type=jnp.float32
    ).astype(o_ref.dtype)


def _resident_rhs_matmul(a_p, b_p, tm, vmem_limit):
    mp, kp = a_p.shape
    np_ = b_p.shape[1]
    grid = (mp // tm,)
    return pl.pallas_call(
        _resident_rhs_matmul_kernel,
        out_shape=jax.ShapeDtypeStruct((mp, np_), jnp.float32),
        grid_spec=pltpu.PrefetchScalarGridSpec(
            num_scalar_prefetch=0,
            grid=grid,
            in_specs=[
                pl.BlockSpec((tm, kp), lambda i: (i, 0)),
                # RHS: constant block index -> fetched once, VMEM-resident.
                pl.BlockSpec((kp, np_), lambda i: (0, 0)),
            ],
            out_specs=pl.BlockSpec((tm, np_), lambda i: (i, 0)),
        ),
        compiler_params=pltpu.CompilerParams(
            dimension_semantics=("parallel",),
            vmem_limit_bytes=vmem_limit,
        ),
    )(a_p, b_p)


# ---------------------------------------------------------------------------
# GCN forward
# ---------------------------------------------------------------------------
def gcn_forward(x, adj, weight, *, precision="bfloat16", _force_fallback=False):
    """h = adj @ (x @ weight).

    precision="bfloat16" (default): MXU operands (adj, x, W, support) in bf16,
    f32 accumulation, f32 output (typically ~1e-2 relative vs the f32
    reference; ~2x less HBM traffic on the dominant N^2 adj stream).
    precision="float32": full f32 data path, matches the PyTorch reference.
    """
    n, fi = x.shape
    fi2, fo = weight.shape
    assert fi == fi2, "feature dims mismatch"
    assert adj.shape == (n, n), "adj must be (N, N)"

    cdtype = jnp.bfloat16 if precision == "bfloat16" else jnp.float32
    itemsize = jnp.dtype(cdtype).itemsize
    vmem_limit, budget = _vmem_budgets()

    tm = _TM
    fi_pad = _round_up(fi, _LANE)
    fo_pad = _round_up(fo, _LANE)

    # Shard the adj row-slab sweep across 2 TensorCores (v7x) when there is
    # enough work; the per-core support recompute is O(N*fi*fo), negligible vs
    # the O(N^2*fo) adj sweep.  On single-TC parts the second group simply
    # runs sequentially on the same core.
    n_groups = 2 if _round_up(n, tm) // tm >= 4 else 1
    n_pad = _round_up(n, n_groups * tm)

    # Fused working set: x/W/support are single-buffered scratch, adj slab and
    # the f32 output tile are double-buffered by the pipeline, plus one
    # transient f32 x@W result before the bf16 cast of `support`.
    fused_bytes = (
        itemsize * (n_pad * fi_pad + fi_pad * fo_pad + n_pad * fo_pad)
        + (4 * n_pad * fo_pad if cdtype == jnp.bfloat16 else 0)
        + itemsize * 2 * tm * n_pad
        + 4 * 2 * tm * fo_pad
    )

    if fused_bytes <= budget and not _force_fallback:
        x_p = _pad2(x, n_pad, fi_pad, cdtype)
        w_p = _pad2(weight, fi_pad, fo_pad, cdtype)
        adj_p = _pad2(adj, n_pad, n_pad, cdtype)
        out = _fused_gcn(x_p, w_p, adj_p, tm, n_groups, vmem_limit)
        return out[:n, :fo]

    # Large-graph fallback: tiled x@W, then adj @ support with `support` kept
    # VMEM-resident when it fits (halves the HBM traffic of the mem-bound
    # second matmul); otherwise a second fully tiled matmul.
    support = pallas_matmul(x, weight, compute_dtype=cdtype)  # (n, fo) f32
    n_pad1 = _round_up(n, tm)
    resident_bytes = (
        itemsize * (2 * n_pad1 * fo_pad + 2 * tm * n_pad1) + 4 * 2 * tm * fo_pad
    )
    if resident_bytes <= budget:
        adj_p = _pad2(adj, n_pad1, n_pad1, cdtype)
        sup_p = _pad2(support, n_pad1, fo_pad, cdtype)
        out = _resident_rhs_matmul(adj_p, sup_p, tm, vmem_limit)
        return out[:n, :fo]
    return pallas_matmul(adj, support, compute_dtype=cdtype)


class GraphConvolution:
    """JAX/Pallas port of the PyTorch GraphConvolution module."""

    def __init__(self, in_features, out_features, key, precision="bfloat16"):
        self.in_features = in_features
        self.out_features = out_features
        self.precision = precision
        # matches reset_parameters(): uniform(-stdv, stdv), stdv = 1/sqrt(out_features)
        stdv = 1.0 / math.sqrt(out_features)
        self.weight = jax.random.uniform(
            key,
            (in_features, out_features),
            dtype=jnp.float32,
            minval=-stdv,
            maxval=stdv,
        )

    def __call__(self, x, adj):
        return gcn_forward(x, adj, self.weight, precision=self.precision)


if __name__ == "__main__":
    key = jax.random.PRNGKey(0)
    keys = jax.random.split(key, 9)

    def rel_err(a, b):
        return float(jnp.linalg.norm(a - b) / (jnp.linalg.norm(b) + 1e-30))

    # Case 1: tile-aligned shapes, full f32 path (matches the f32 reference).
    n1, fi1, fo1 = 256, 128, 128
    layer1 = GraphConvolution(fi1, fo1, keys[0], precision="float32")
    x1 = jax.random.normal(keys[1], (n1, fi1), dtype=jnp.float32)
    adj1 = jax.random.uniform(keys[2], (n1, n1), dtype=jnp.float32)
    h1 = jax.block_until_ready(layer1(x1, adj1))
    ref1 = adj1 @ (x1 @ layer1.weight)
    assert h1.shape == (n1, fo1)
    assert jnp.allclose(h1, ref1, rtol=1e-4, atol=1e-3), "f32 fused path mismatch"

    # Case 2: ragged shapes, default bf16 MXU path (f32 accumulate / f32 out).
    n2, fi2, fo2 = 200, 72, 48
    layer2 = GraphConvolution(fi2, fo2, keys[3])
    x2 = jax.random.normal(keys[4], (n2, fi2), dtype=jnp.float32)
    adj2 = jax.random.uniform(keys[5], (n2, n2), dtype=jnp.float32)
    h2 = jax.block_until_ready(layer2(x2, adj2))
    ref2 = adj2 @ (x2 @ layer2.weight)
    assert h2.shape == (n2, fo2)
    assert rel_err(h2, ref2) < 2e-2, "bf16 fused path mismatch"

    # Case 3: enough row slabs to trigger the 2-group (dual-TensorCore) grid.
    n3, fi3, fo3 = 1100, 96, 64
    layer3 = GraphConvolution(fi3, fo3, keys[6])
    x3 = jax.random.normal(keys[7], (n3, fi3), dtype=jnp.float32)
    adj3 = jax.random.uniform(keys[8], (n3, n3), dtype=jnp.float32)
    h3 = jax.block_until_ready(layer3(x3, adj3))
    ref3 = adj3 @ (x3 @ layer3.weight)
    assert h3.shape == (n3, fo3)
    assert rel_err(h3, ref3) < 2e-2, "bf16 2-group fused path mismatch"

    # Case 4: exercise the large-graph fallback (tiled x@W + resident-RHS adj@support).
    h4 = jax.block_until_ready(
        gcn_forward(x3, adj3, layer3.weight, precision="bfloat16", _force_fallback=True)
    )
    assert h4.shape == (n3, fo3)
    assert rel_err(h4, ref3) < 2e-2, "fallback path mismatch"

    print("KERNEL_OK")
</pallas_src>

<mosaic_0001>
module attributes {stable_mosaic.version = 11 : i64} {
  func.func @_fused_gcn_kernel(%arg0: i32, %arg1: i32, %arg2: memref<256x128xf32, #tpu.memory_space<any>>, %arg3: memref<128x128xf32, #tpu.memory_space<any>>, %arg4: memref<256x256xf32, #tpu.memory_space<vmem>>, %arg5: memref<256x128xf32, #tpu.memory_space<vmem>>, %arg6: memref<256x128xf32, #tpu.memory_space<vmem>>, %arg7: memref<128x128xf32, #tpu.memory_space<vmem>>, %arg8: memref<256x128xf32, #tpu.memory_space<vmem>>, %arg9: memref<2x!tpu.dma_semaphore, #tpu.memory_space<semaphore_mem>>) attributes {dimension_semantics = [#tpu.dimension_semantics<parallel>, #tpu.dimension_semantics<arbitrary>], iteration_bounds = array<i64: 1, 1>, scalar_prefetch = 0 : i64, scratch_operands = 4 : i64, tpu.core_type = #tpu.core_type<tc>, window_params = [{}, {}, {transform_indices = @transform_2, window_bounds = array<i64: 256, 256>}, {transform_indices = @transform_3, window_bounds = array<i64: 256, 128>}]} {
    %c0_i32 = arith.constant 0 : i32
    %0 = arith.cmpi eq, %arg1, %c0_i32 : i32
    %1 = arith.extui %0 : i1 to i32
    %c0_i32_0 = arith.constant 0 : i32
    %2 = arith.cmpi ne, %1, %c0_i32_0 : i32
    scf.if %2 {
      %c0_i32_6 = arith.constant 0 : i32
      %7 = tpu.memref_slice %arg9[%c0_i32_6] : memref<2x!tpu.dma_semaphore, #tpu.memory_space<semaphore_mem>> -> memref<1x!tpu.dma_semaphore, #tpu.memory_space<semaphore_mem>>
      %8 = tpu.memref_squeeze %7 : memref<1x!tpu.dma_semaphore, #tpu.memory_space<semaphore_mem>> -> memref<!tpu.dma_semaphore, #tpu.memory_space<semaphore_mem>>
      tpu.enqueue_dma source(%arg2 : memref<256x128xf32, #tpu.memory_space<any>>) target(%arg6 : memref<256x128xf32, #tpu.memory_space<vmem>>) target_semaphore(%8 : memref<!tpu.dma_semaphore, #tpu.memory_space<semaphore_mem>>)
      %c1_i32 = arith.constant 1 : i32
      %9 = tpu.memref_slice %arg9[%c1_i32] : memref<2x!tpu.dma_semaphore, #tpu.memory_space<semaphore_mem>> -> memref<1x!tpu.dma_semaphore, #tpu.memory_space<semaphore_mem>>
      %10 = tpu.memref_squeeze %9 : memref<1x!tpu.dma_semaphore, #tpu.memory_space<semaphore_mem>> -> memref<!tpu.dma_semaphore, #tpu.memory_space<semaphore_mem>>
      tpu.enqueue_dma source(%arg3 : memref<128x128xf32, #tpu.memory_space<any>>) target(%arg7 : memref<128x128xf32, #tpu.memory_space<vmem>>) target_semaphore(%10 : memref<!tpu.dma_semaphore, #tpu.memory_space<semaphore_mem>>)
      %c0_i32_7 = arith.constant 0 : i32
      %11 = tpu.memref_slice %arg9[%c0_i32_7] : memref<2x!tpu.dma_semaphore, #tpu.memory_space<semaphore_mem>> -> memref<1x!tpu.dma_semaphore, #tpu.memory_space<semaphore_mem>>
      %12 = tpu.memref_squeeze %11 : memref<1x!tpu.dma_semaphore, #tpu.memory_space<semaphore_mem>> -> memref<!tpu.dma_semaphore, #tpu.memory_space<semaphore_mem>>
      tpu.wait_dma2 semaphore(%12 : memref<!tpu.dma_semaphore, #tpu.memory_space<semaphore_mem>>) src(%arg2 : memref<256x128xf32, #tpu.memory_space<any>>) dst(%arg6 : memref<256x128xf32, #tpu.memory_space<vmem>>)
      %c1_i32_8 = arith.constant 1 : i32
      %13 = tpu.memref_slice %arg9[%c1_i32_8] : memref<2x!tpu.dma_semaphore, #tpu.memory_space<semaphore_mem>> -> memref<1x!tpu.dma_semaphore, #tpu.memory_space<semaphore_mem>>
      %14 = tpu.memref_squeeze %13 : memref<1x!tpu.dma_semaphore, #tpu.memory_space<semaphore_mem>> -> memref<!tpu.dma_semaphore, #tpu.memory_space<semaphore_mem>>
      tpu.wait_dma2 semaphore(%14 : memref<!tpu.dma_semaphore, #tpu.memory_space<semaphore_mem>>) src(%arg3 : memref<128x128xf32, #tpu.memory_space<any>>) dst(%arg7 : memref<128x128xf32, #tpu.memory_space<vmem>>)
      %c0_9 = arith.constant 0 : index
      %c0_10 = arith.constant 0 : index
      %15 = vector.load %arg6[%c0_9, %c0_10] : memref<256x128xf32, #tpu.memory_space<vmem>>, vector<256x128xf32>
      %c0_11 = arith.constant 0 : index
      %c0_12 = arith.constant 0 : index
      %16 = vector.load %arg7[%c0_11, %c0_12] : memref<128x128xf32, #tpu.memory_space<vmem>>, vector<128x128xf32>
      %cst_13 = arith.constant dense<0.000000e+00> : vector<256x128xf32>
      %17 = tpu.matmul %15, %16, %cst_13 {dimension_numbers = #tpu.dot_dimension_numbers<[1], [0], [0], [1], [0, 0, 1, 1], [], []>} : vector<256x128xf32>, vector<128x128xf32>, vector<256x128xf32> -> vector<256x128xf32>
      %c0_14 = arith.constant 0 : index
      %c0_15 = arith.constant 0 : index
      %18 = vector.load %arg8[%c0_14, %c0_15] : memref<256x128xf32, #tpu.memory_space<vmem>>, vector<256x128xf32>
      tpu.vector_store %arg8[%c0_14, %c0_15], %17 {strides = array<i32>} : memref<256x128xf32, #tpu.memory_space<vmem>>, vector<256x128xf32>,
    } else {
    }
    %c0 = arith.constant 0 : index
    %c0_1 = arith.constant 0 : index
    %3 = vector.load %arg4[%c0, %c0_1] : memref<256x256xf32, #tpu.memory_space<vmem>>, vector<256x256xf32>
    %c0_2 = arith.constant 0 : index
    %c0_3 = arith.constant 0 : index
    %4 = vector.load %arg8[%c0_2, %c0_3] : memref<256x128xf32, #tpu.memory_space<vmem>>, vector<256x128xf32>
    %cst = arith.constant dense<0.000000e+00> : vector<256x128xf32>
    %5 = tpu.matmul %3, %4, %cst {dimension_numbers = #tpu.dot_dimension_numbers<[1], [0], [0], [1], [0, 0, 1, 1], [], []>} : vector<256x256xf32>, vector<256x128xf32>, vector<256x128xf32> -> vector<256x128xf32>
    %c0_4 = arith.constant 0 : index
    %c0_5 = arith.constant 0 : index
    %6 = vector.load %arg5[%c0_4, %c0_5] : memref<256x128xf32, #tpu.memory_space<vmem>>, vector<256x128xf32>
    tpu.vector_store %arg5[%c0_4, %c0_5], %5 {strides = array<i32>} : memref<256x128xf32, #tpu.memory_space<vmem>>, vector<256x128xf32>,
    return
  }
  func.func @transform_2(%arg0: i32, %arg1: i32) -> (i32, i32) {
    %c1_i32 = arith.constant 1 : i32
    %0 = arith.muli %arg0, %c1_i32 : i32
    %1 = arith.addi %0, %arg1 : i32
    %c0_i32 = arith.constant 0 : i32
    %c0_i32_0 = arith.constant 0 : i32
    return %1, %c0_i32 : i32, i32
  }
  func.func @transform_3(%arg0: i32, %arg1: i32) -> (i32, i32) {
    %c1_i32 = arith.constant 1 : i32
    %0 = arith.muli %arg0, %c1_i32 : i32
    %1 = arith.addi %0, %arg1 : i32
    %c0_i32 = arith.constant 0 : i32
    %c0_i32_0 = arith.constant 0 : i32
    return %1, %c0_i32 : i32, i32
  }
}

</mosaic_0001>

<bundles_post_ra>
// kernel: tpu_custom_call.1
= control target key start
LH: loop header
LB: loop body
LE: loop exit
PB: predicated region body
PF: predicated region fallthrough
CT: control target
= control target key end

     0   :  { %8 = vsyncpa [#allocation7], 0  ;;  %s1215_s0 = inlined_call_operand.hbm [shape: f32[256,128], index: 0, kind: input, shape index: {}]   ;;  %s1216_s1 = inlined_call_operand.hbm [shape: f32[128,128], index: 1, kind: input, shape index: {}]   ;;  %s1217_s2 = inlined_call_operand.hbm [shape: f32[256,256], index: 2, kind: input, shape index: {}]   ;;  %s1218_s3 = inlined_call_operand.hbm [shape: f32[256,128], index: 3, kind: output, shape index: {}]  }
   0x1   :  { %9 = vsyncpa [#allocation8], 0  ;;  %s1106_s12 = smov [#allocation6]   ;;  %s1010_s16 = scalar_lea.hbm %s1217_s2, 8192 }
   0x2   :  { %s20_s13 = sshll.u32 %s1106_s12, 4  ;;  %p1011_p0 = scmp.ne.s32.totalorder %s1217_s2, %s1010_s16  ;;  %s21_s13 = int_to_ptr.vmem [resolvable:$true] %s20_s13 }
   0x3   :  { %p1014_p1 = scmp.lt.u32.totalorder %s1010_s16, %s1217_s2 }
   0x5   :  { %p1016_p2 = pnand %p1014_p1, %p1011_p0 }
   0x7   :  { %1019 = shalt.err (!%p1016_p2)
}
   0x8   :  { %s1020_s21 = scalar_lea.vmem %s21_s13, 8192  ;;  %p1025_p4 = scmp.lt.s32.totalorder %s21_s13, %s21_s13 }
   0x9   :  { %p1021_p3 = scmp.ne.s32.totalorder %s21_s13, %s1020_s21  ;;  %p1026_p5 = scmp.lt.s32.totalorder %s1020_s21, %s1020_s21 }
   0xb   :  { %p1027_p6 = por %p1026_p5, %p1025_p4 }
   0xd   :  { %p1028_p7 = pnand %p1027_p6, %p1021_p3 }
   0xf   :  { %1031 = shalt.err (!%p1028_p7)
}
  0x10   :  { %s1107_s22 = smov 256   ;;  %s1108_s23 = smov 16  }
  0x11   :  { %26 = dma.hbm_to_vmem [thread:$0]  %s1217_s2, 8192, %s21_s13, [#allocation7], %s1107_s22, %s1107_s22, %s1108_s23  }
  0x12   :  { %1098 = dma.done.wait [#allocation7], 8192  }
  0x13   :  { %1099 = vsyncadd [#allocation7], 4294959104  ;;  %s1109_s26 = smov [#allocation2]   ;;  %s1110_s28 = smov [#allocation3]  }
  0x14   :  { %s45_s27 = sshll.u32 %s1109_s26, 4  ;;  %s57_s29 = sshll.u32 %s1110_s28, 4  ;;  %s46_s27 = int_to_ptr.vmem [resolvable:$true] %s45_s27  ;;  %s58_s29 = int_to_ptr.vmem [resolvable:$true] %s57_s29 }
  0x15   :  { %s1032_s5 = scalar_lea.hbm %s1215_s0, 4096 }
  0x16   :  { %p1033_p8 = scmp.ne.s32.totalorder %s1215_s0, %s1032_s5  ;;  %p1036_p9 = scmp.lt.u32.totalorder %s1032_s5, %s1215_s0 }
  0x18   :  { %p1038_p10 = pnand %p1036_p9, %p1033_p8 }
  0x1a   :  { %1041 = shalt.err (!%p1038_p10)  }
  0x1b   :  { %s1042_s2 = scalar_lea.vmem %s46_s27, 4096  ;;  %p1047_p12 = scmp.lt.s32.totalorder %s46_s27, %s46_s27 }
  0x1c   :  { %p1043_p11 = scmp.ne.s32.totalorder %s46_s27, %s1042_s2  ;;  %p1048_p13 = scmp.lt.s32.totalorder %s1042_s2, %s1042_s2 }
  0x1e   :  { %p1049_p0 = por %p1048_p13, %p1047_p12 }
  0x20   :  { %p1050_p1 = pnand %p1049_p0, %p1043_p11 }
  0x22   :  { %1053 = shalt.err (!%p1050_p1)  }
  0x23   :  { %48 = dma.hbm_to_vmem [thread:$0]  %s1215_s0, 4096, %s46_s27, [#allocation5] }
  0x24   :  { %s1054_s14 = scalar_lea.hbm %s1216_s1, 2048 }
  0x25   :  { %p1055_p2 = scmp.ne.s32.totalorder %s1216_s1, %s1054_s14  ;;  %p1058_p3 = scmp.lt.u32.totalorder %s1054_s14, %s1216_s1 }
  0x27   :  { %p1060_p4 = pnand %p1058_p3, %p1055_p2 }
  0x29   :  { %1063 = shalt.err (!%p1060_p4)  }
  0x2a   :  { %s1064_s19 = scalar_lea.vmem %s58_s29, 2048  ;;  %p1069_p6 = scmp.lt.s32.totalorder %s58_s29, %s58_s29 }
  0x2b   :  { %p1065_p5 = scmp.ne.s32.totalorder %s58_s29, %s1064_s19  ;;  %p1070_p7 = scmp.lt.s32.totalorder %s1064_s19, %s1064_s19 }
  0x2d   :  { %p1071_p8 = por %p1070_p7, %p1069_p6 }
  0x2f   :  { %p1072_p9 = pnand %p1071_p8, %p1065_p5 }
  0x31   :  { %1075 = shalt.err (!%p1072_p9)  }
  0x32   :  { %60 = dma.hbm_to_vmem [thread:$0]  %s1216_s1, 2048, %s58_s29, [#allocation5 + $0x1] }
  0x33   :  { %1100 = dma.done.wait [#allocation5], 4096 }
  0x34   :  { %1101 = vsyncadd [#allocation5], 4294963200 }
  0x35   :  { %1102 = dma.done.wait [#allocation5 + $0x1], 2048 }
  0x36   :  { %1103 = vsyncadd [#allocation5 + $0x1], 4294965248  ;;  %v99_v0 = vld [vmem:[#allocation3] sm:$0xff]  ;;  %v100_v1 = vld [vmem:[#allocation3 + $0x8] sm:$0xff]  ;;  %v1111_v56 = vmov 0.0|0.0   ;;  %s1112_s1 = smov [#allocation9]  }
  0x37   :  { %v101_v2 = vld [vmem:[#allocation3 + $0x10] sm:$0xff]  ;;  %v889_v3 = vpack.c.bf16 %v100_v1, %v99_v0  ;;  %v102_v4 = vld [vmem:[#allocation3 + $0x18] sm:$0xff]  ;;  %v103_v6 = vld [vmem:[#allocation3 + $0x20] sm:$0xff]  ;;  %969 = vmatprep.subr.bf16.mxu1 %v1111_v56  ;;  %s734_s21 = sshll.u32 %s1112_s1, 4  ;;  %s735_s21 = int_to_ptr.vmem [resolvable:$true] %s734_s21 }
  0x38   :  { %v893_v5 = vpack.c.bf16 %v102_v4, %v101_v2  ;;  %v104_v7 = vld [vmem:[#allocation3 + $0x28] sm:$0xff]  ;;  %v67_v9 = vld [vmem:[#allocation2] sm:$0xff]  ;;  %v105_v10 = vld [vmem:[#allocation3 + $0x30] sm:$0xff]  ;;  %s1076_s22 = scalar_lea.vmem %s735_s21, 4096  ;;  %p1081_p11 = scmp.lt.s32.totalorder %s735_s21, %s735_s21 }
  0x39   :  { %890 = vmatprep.subr.bf16.mxu0 %v889_v3  ;;  %v897_v8 = vpack.c.bf16 %v104_v7, %v103_v6  ;;  %v106_v11 = vld [vmem:[#allocation3 + $0x38] sm:$0xff]  ;;  %841 = vmatprep.mubr.f32.mxu0 %v67_v9  ;;  %v107_v13 = vld [vmem:[#allocation3 + $0x40] sm:$0xff]  ;;  %v108_v14 = vld [vmem:[#allocation3 + $0x48] sm:$0xff]  ;;  %p1077_p10 = scmp.ne.s32.totalorder %s735_s21, %s1076_s22  ;;  %p1082_p12 = scmp.lt.s32.totalorder %s1076_s22, %s1076_s22 }
  0x3a   :  { %892 = vmatpush3.bf16.msra.mxu0 %v889_v3  ;;  %v901_v12 = vpack.c.bf16 %v106_v11, %v105_v10  ;;  %v905_v15 = vpack.c.bf16 %v108_v14, %v107_v13  ;;  %v109_v16 = vld [vmem:[#allocation3 + $0x50] sm:$0xff]  ;;  %v110_v17 = vld [vmem:[#allocation3 + $0x58] sm:$0xff]  ;;  %v111_v19 = vld [vmem:[#allocation3 + $0x60] sm:$0xff] }
  0x3b   :  { %894 = vmatprep.subr.bf16.mxu0 %v893_v5  ;;  %v909_v18 = vpack.c.bf16 %v110_v17, %v109_v16  ;;  %v112_v20 = vld [vmem:[#allocation3 + $0x68] sm:$0xff]  ;;  %v113_v22 = vld [vmem:[#allocation3 + $0x70] sm:$0xff]  ;;  %v114_v23 = vld [vmem:[#allocation3 + $0x78] sm:$0xff]  ;;  %p1083_p13 = por %p1082_p12, %p1081_p11 }
  0x3c   :  { %v913_v21 = vpack.c.bf16 %v112_v20, %v111_v19  ;;  %v917_v24 = vpack.c.bf16 %v114_v23, %v113_v22  ;;  %v68_v25 = vld [vmem:[#allocation2 + $0x8] sm:$0xff]  ;;  %v69_v26 = vld [vmem:[#allocation2 + $0x10] sm:$0xff]  ;;  %v70_v27 = vld [vmem:[#allocation2 + $0x18] sm:$0xff] }
  0x3d   :  { %v71_v28 = vld [vmem:[#allocation2 + $0x20] sm:$0xff]  ;;  %v72_v29 = vld [vmem:[#allocation2 + $0x28] sm:$0xff]  ;;  %v73_v30 = vld [vmem:[#allocation2 + $0x30] sm:$0xff]  ;;  %p1084_p0 = pnand %p1083_p13, %p1077_p10 }
  0x3e   :  { %896 = vmatpush3.bf16.msra.mxu0 %v893_v5  ;;  %v74_v31 = vld [vmem:[#allocation2 + $0x38] sm:$0xff]  ;;  %v75_v32 = vld [vmem:[#allocation2 + $0x40] sm:$0xff]  ;;  %v76_v33 = vld [vmem:[#allocation2 + $0x48] sm:$0xff] }
  0x3f   :  { %898 = vmatprep.subr.bf16.mxu0 %v897_v8  ;;  %v77_v34 = vld [vmem:[#allocation2 + $0x50] sm:$0xff]  ;;  %v78_v35 = vld [vmem:[#allocation2 + $0x58] sm:$0xff]  ;;  %v79_v36 = vld [vmem:[#allocation2 + $0x60] sm:$0xff] }
  0x40   :  { %v80_v37 = vld [vmem:[#allocation2 + $0x68] sm:$0xff]  ;;  %v81_v38 = vld [vmem:[#allocation2 + $0x70] sm:$0xff]  ;;  %v82_v39 = vld [vmem:[#allocation2 + $0x78] sm:$0xff] }
  0x41   :  { %v83_v40 = vld [vmem:[#allocation2 + $0x80] sm:$0xff]  ;;  %v84_v41 = vld [vmem:[#allocation2 + $0x88] sm:$0xff]  ;;  %v85_v42 = vld [vmem:[#allocation2 + $0x90] sm:$0xff] }
  0x42   :  { %900 = vmatpush3.bf16.msra.mxu0 %v897_v8  ;;  %v86_v43 = vld [vmem:[#allocation2 + $0x98] sm:$0xff]  ;;  %v87_v44 = vld [vmem:[#allocation2 + $0xa0] sm:$0xff]  ;;  %v88_v45 = vld [vmem:[#allocation2 + $0xa8] sm:$0xff] }
  0x43   :  { %902 = vmatprep.subr.bf16.mxu0 %v901_v12  ;;  %v89_v46 = vld [vmem:[#allocation2 + $0xb0] sm:$0xff]  ;;  %v90_v47 = vld [vmem:[#allocation2 + $0xb8] sm:$0xff]  ;;  %v91_v48 = vld [vmem:[#allocation2 + $0xc0] sm:$0xff] }
  0x44   :  { %v92_v49 = vld [vmem:[#allocation2 + $0xc8] sm:$0xff]  ;;  %v93_v50 = vld [vmem:[#allocation2 + $0xd0] sm:$0xff]  ;;  %v94_v51 = vld [vmem:[#allocation2 + $0xd8] sm:$0xff] }
  0x45   :  { %v95_v52 = vld [vmem:[#allocation2 + $0xe0] sm:$0xff]  ;;  %v96_v53 = vld [vmem:[#allocation2 + $0xe8] sm:$0xff]  ;;  %v97_v54 = vld [vmem:[#allocation2 + $0xf0] sm:$0xff] }
  0x46   :  { %904 = vmatpush3.bf16.msra.mxu0 %v901_v12  ;;  %v98_v55 = vld [vmem:[#allocation2 + $0xf8] sm:$0xff]  ;;  %v397_v57 = vld [vmem:[#allocation6 + $0xc8] sm:$0xff] }
  0x47   :  { %906 = vmatprep.subr.bf16.mxu0 %v905_v15  ;;  %592 = vmatprep.mubr.f32.mxu1 %v397_v57  ;;  %v373_v58 = vld [vmem:[#allocation6 + $0x8] sm:$0xff] }
  0x48   :  { %v405_v57 = vld [vmem:[#allocation6 + $0x108] sm:$0xff] }
  0x4a   :  { %908 = vmatpush3.bf16.msra.mxu0 %v905_v15 }
  0x4b   :  { %910 = vmatprep.subr.bf16.mxu0 %v909_v18 }
  0x4e   :  { %912 = vmatpush3.bf16.msra.mxu0 %v909_v18 }
  0x4f   :  { %914 = vmatprep.subr.bf16.mxu0 %v913_v21 }
  0x52   :  { %916 = vmatpush3.bf16.msra.mxu0 %v913_v21 }
  0x53   :  { %918 = vmatprep.subr.bf16.mxu0 %v917_v24 }
  0x56   :  { %920 = vmatpush3.bf16.msra.mxu0 %v917_v24 }
  0x57   :  { %921 = vmatprep.subr.bf16.mxu0 %v1111_v56 }
  0x59   :  { %842 = vmatmul.mubr.f32.vlgmr.msra.gmra.mrb[0].mxu0 %v68_v25 }
  0x5a   :  { %844 = vmatprep.mubr.f32.mxu0 %v69_v26 }
  0x5d   :  { %845 = vmatmul.mubr.f32.gmra.mrb[2].mxu0 %v70_v27 }
  0x5e   :  { %847 = vmatprep.mubr.f32.mxu0 %v71_v28 }
  0x61   :  { %848 = vmatmul.mubr.f32.gmra.mrb[4].mxu0 %v72_v29 }
  0x62   :  { %850 = vmatprep.mubr.f32.mxu0 %v73_v30 }
  0x65   :  { %851 = vmatmul.mubr.f32.gmra.mrb[6].mxu0 %v74_v31 }
  0x66   :  { %853 = vmatprep.mubr.f32.mxu0 %v75_v32 }
  0x69   :  { %854 = vmatmul.mubr.f32.gmra.mrb[8].mxu0 %v76_v33 }
  0x6a   :  { %856 = vmatprep.mubr.f32.mxu0 %v77_v34 }
  0x6d   :  { %857 = vmatmul.mubr.f32.gmra.mrb[10].mxu0 %v78_v35 }
  0x6e   :  { %859 = vmatprep.mubr.f32.mxu0 %v79_v36 }
  0x71   :  { %860 = vmatmul.mubr.f32.gmra.mrb[12].mxu0 %v80_v37 }
  0x72   :  { %862 = vmatprep.mubr.f32.mxu0 %v81_v38 }
  0x75   :  { %863 = vmatmul.mubr.f32.gmra.mrb[14].mxu0 %v82_v39 }
  0x76   :  { %865 = vmatprep.mubr.f32.mxu0 %v83_v40 }
  0x79   :  { %866 = vmatmul.mubr.f32.gmra.mrb[16].mxu0 %v84_v41 }
  0x7a   :  { %868 = vmatprep.mubr.f32.mxu0 %v85_v42 }
  0x7d   :  { %869 = vmatmul.mubr.f32.gmra.mrb[18].mxu0 %v86_v43  ;;  %v396_v43 = vld [vmem:[#allocation6 + $0xc0] sm:$0xff] }
  0x7e   :  { %871 = vmatprep.mubr.f32.mxu0 %v87_v44  ;;  %v372_v44 = vld [vmem:[#allocation6] sm:$0xff] }
  0x81   :  { %872 = vmatmul.mubr.f32.gmra.mrb[20].mxu0 %v88_v45  ;;  %v399_v45 = vld [vmem:[#allocation6 + $0xd8] sm:$0xff] }
  0x82   :  { %874 = vmatprep.mubr.f32.mxu0 %v89_v46  ;;  %v375_v46 = vld [vmem:[#allocation6 + $0x18] sm:$0xff] }
  0x85   :  { %875 = vmatmul.mubr.f32.gmra.mrb[22].mxu0 %v90_v47  ;;  %v398_v47 = vld [vmem:[#allocation6 + $0xd0] sm:$0xff] }
  0x86   :  { %877 = vmatprep.mubr.f32.mxu0 %v91_v48  ;;  %v374_v48 = vld [vmem:[#allocation6 + $0x10] sm:$0xff] }
  0x89   :  { %878 = vmatmul.mubr.f32.gmra.mrb[24].mxu0 %v92_v49  ;;  %v401_v49 = vld [vmem:[#allocation6 + $0xe8] sm:$0xff] }
  0x8a   :  { %880 = vmatprep.mubr.f32.mxu0 %v93_v50  ;;  %v377_v50 = vld [vmem:[#allocation6 + $0x28] sm:$0xff] }
  0x8d   :  { %881 = vmatmul.mubr.f32.gmra.mrb[26].mxu0 %v94_v51  ;;  %v400_v51 = vld [vmem:[#allocation6 + $0xe0] sm:$0xff] }
  0x8e   :  { %883 = vmatprep.mubr.f32.mxu0 %v95_v52  ;;  %v376_v52 = vld [vmem:[#allocation6 + $0x20] sm:$0xff] }
  0x91   :  { %884 = vmatmul.mubr.f32.gmra.mrb[28].mxu0 %v96_v53  ;;  %v403_v53 = vld [vmem:[#allocation6 + $0xf8] sm:$0xff] }
  0x92   :  { %886 = vmatprep.mubr.f32.mxu0 %v97_v54  ;;  %v379_v54 = vld [vmem:[#allocation6 + $0x38] sm:$0xff] }
  0x95   :  { %887 = vmatmul.mubr.f32.gmra.mrb[30].mxu0 %v98_v55  ;;  %v402_v55 = vld [vmem:[#allocation6 + $0xf0] sm:$0xff] }
  0x96   :  { %532 = vmatprep.mubr.f32.mxu0 %v373_v58  ;;  %v381_v58 = vld [vmem:[#allocation6 + $0x48] sm:$0xff] }
 0x12c   :  { %v843_v59 = vpop.f32.mrb[0].mxu0 }
 0x12d   :  { %v181_v60 = vpop.f32.mrb[1].mxu0 }
 0x12e   :  { %v922_v61 = vpack.c.bf16 %v843_v59, %v181_v60  ;;  %v404_v59 = vld [vmem:[#allocation6 + $0x100] sm:$0xff] }
 0x12f   :  { %v380_v60 = vld [vmem:[#allocation6 + $0x40] sm:$0xff] }
 0x130   :  { %v846_v62 = vpop.f32.mrb[2].mxu0  ;;  %923 = vmatpush1.bf16.msra.mxu0 %v922_v61  ;;  %985 = vmatpush1.bf16.msra.mxu1 %v922_v61  ;;  %v407_v61 = vld [vmem:[#allocation6 + $0x118] sm:$0xff] }
 0x131   :  { %v191_v63 = vpop.f32.mrb[3].mxu0  ;;  %924 = vmatprep.subr.bf16.mxu0 %v1111_v56  ;;  %970 = vmatprep.subr.bf16.mxu1 %v1111_v56 }
 0x132   :  { %v925_v0 = vpack.c.bf16 %v846_v62, %v191_v63  ;;  %v383_v62 = vld [vmem:[#allocation6 + $0x58] sm:$0xff]  ;;  %v406_v63 = vld [vmem:[#allocation6 + $0x110] sm:$0xff] }
 0x134   :  { %v849_v1 = vpop.f32.mrb[4].mxu0  ;;  %926 = vmatpush1.bf16.msra.mxu0 %v925_v0  ;;  %986 = vmatpush1.bf16.msra.mxu1 %v925_v0  ;;  %v382_v0 = vld [vmem:[#allocation6 + $0x50] sm:$0xff] }
 0x135   :  { %v201_v2 = vpop.f32.mrb[5].mxu0  ;;  %927 = vmatprep.subr.bf16.mxu0 %v1111_v56  ;;  %971 = vmatprep.subr.bf16.mxu1 %v1111_v56 }
 0x136   :  { %v928_v3 = vpack.c.bf16 %v849_v1, %v201_v2  ;;  %v409_v1 = vld [vmem:[#allocation6 + $0x128] sm:$0xff] }
 0x137   :  { %v385_v2 = vld [vmem:[#allocation6 + $0x68] sm:$0xff] }
 0x138   :  { %v852_v4 = vpop.f32.mrb[6].mxu0  ;;  %929 = vmatpush1.bf16.msra.mxu0 %v928_v3  ;;  %987 = vmatpush1.bf16.msra.mxu1 %v928_v3  ;;  %v408_v3 = vld [vmem:[#allocation6 + $0x120] sm:$0xff] }
 0x139   :  { %v211_v5 = vpop.f32.mrb[7].mxu0  ;;  %930 = vmatprep.subr.bf16.mxu0 %v1111_v56  ;;  %972 = vmatprep.subr.bf16.mxu1 %v1111_v56 }
 0x13a   :  { %v931_v6 = vpack.c.bf16 %v852_v4, %v211_v5  ;;  %v384_v4 = vld [vmem:[#allocation6 + $0x60] sm:$0xff]  ;;  %v411_v5 = vld [vmem:[#allocation6 + $0x138] sm:$0xff] }
 0x13c   :  { %v855_v7 = vpop.f32.mrb[8].mxu0  ;;  %932 = vmatpush1.bf16.msra.mxu0 %v931_v6  ;;  %988 = vmatpush1.bf16.msra.mxu1 %v931_v6  ;;  %v387_v6 = vld [vmem:[#allocation6 + $0x78] sm:$0xff] }
 0x13d   :  { %v221_v8 = vpop.f32.mrb[9].mxu0  ;;  %933 = vmatprep.subr.bf16.mxu0 %v1111_v56  ;;  %973 = vmatprep.subr.bf16.mxu1 %v1111_v56 }
 0x13e   :  { %v934_v9 = vpack.c.bf16 %v855_v7, %v221_v8  ;;  %v410_v7 = vld [vmem:[#allocation6 + $0x130] sm:$0xff] }
 0x13f   :  { %v386_v8 = vld [vmem:[#allocation6 + $0x70] sm:$0xff] }
 0x140   :  { %v858_v10 = vpop.f32.mrb[10].mxu0  ;;  %935 = vmatpush1.bf16.msra.mxu0 %v934_v9  ;;  %989 = vmatpush1.bf16.msra.mxu1 %v934_v9  ;;  %v413_v9 = vld [vmem:[#allocation6 + $0x148] sm:$0xff] }
 0x141   :  { %v231_v11 = vpop.f32.mrb[11].mxu0  ;;  %936 = vmatprep.subr.bf16.mxu0 %v1111_v56  ;;  %974 = vmatprep.subr.bf16.mxu1 %v1111_v56 }
 0x142   :  { %v937_v12 = vpack.c.bf16 %v858_v10, %v231_v11  ;;  %v389_v10 = vld [vmem:[#allocation6 + $0x88] sm:$0xff]  ;;  %v412_v11 = vld [vmem:[#allocation6 + $0x140] sm:$0xff] }
 0x144   :  { %v861_v13 = vpop.f32.mrb[12].mxu0  ;;  %938 = vmatpush1.bf16.msra.mxu0 %v937_v12  ;;  %990 = vmatpush1.bf16.msra.mxu1 %v937_v12  ;;  %v388_v12 = vld [vmem:[#allocation6 + $0x80] sm:$0xff] }
 0x145   :  { %v241_v14 = vpop.f32.mrb[13].mxu0  ;;  %939 = vmatprep.subr.bf16.mxu0 %v1111_v56  ;;  %975 = vmatprep.subr.bf16.mxu1 %v1111_v56 }
 0x146   :  { %v940_v15 = vpack.c.bf16 %v861_v13, %v241_v14  ;;  %v415_v13 = vld [vmem:[#allocation6 + $0x158] sm:$0xff] }
 0x147   :  { %v391_v14 = vld [vmem:[#allocation6 + $0x98] sm:$0xff] }
 0x148   :  { %v864_v16 = vpop.f32.mrb[14].mxu0  ;;  %941 = vmatpush1.bf16.msra.mxu0 %v940_v15  ;;  %991 = vmatpush1.bf16.msra.mxu1 %v940_v15  ;;  %v414_v15 = vld [vmem:[#allocation6 + $0x150] sm:$0xff] }
 0x149   :  { %v251_v17 = vpop.f32.mrb[15].mxu0  ;;  %942 = vmatprep.subr.bf16.mxu0 %v1111_v56  ;;  %976 = vmatprep.subr.bf16.mxu1 %v1111_v56 }
 0x14a   :  { %v943_v18 = vpack.c.bf16 %v864_v16, %v251_v17  ;;  %v390_v16 = vld [vmem:[#allocation6 + $0x90] sm:$0xff]  ;;  %v417_v17 = vld [vmem:[#allocation6 + $0x168] sm:$0xff] }
 0x14c   :  { %v867_v19 = vpop.f32.mrb[16].mxu0  ;;  %944 = vmatpush1.bf16.msra.mxu0 %v943_v18  ;;  %992 = vmatpush1.bf16.msra.mxu1 %v943_v18  ;;  %v393_v18 = vld [vmem:[#allocation6 + $0xa8] sm:$0xff] }
 0x14d   :  { %v261_v20 = vpop.f32.mrb[17].mxu0  ;;  %945 = vmatprep.subr.bf16.mxu0 %v1111_v56  ;;  %977 = vmatprep.subr.bf16.mxu1 %v1111_v56 }
 0x14e   :  { %v946_v21 = vpack.c.bf16 %v867_v19, %v261_v20  ;;  %v416_v19 = vld [vmem:[#allocation6 + $0x160] sm:$0xff] }
 0x14f   :  { %v392_v20 = vld [vmem:[#allocation6 + $0xa0] sm:$0xff] }
 0x150   :  { %v870_v22 = vpop.f32.mrb[18].mxu0  ;;  %947 = vmatpush1.bf16.msra.mxu0 %v946_v21  ;;  %993 = vmatpush1.bf16.msra.mxu1 %v946_v21  ;;  %v419_v21 = vld [vmem:[#allocation6 + $0x178] sm:$0xff] }
 0x151   :  { %v271_v23 = vpop.f32.mrb[19].mxu0  ;;  %948 = vmatprep.subr.bf16.mxu0 %v1111_v56  ;;  %978 = vmatprep.subr.bf16.mxu1 %v1111_v56 }
 0x152   :  { %v949_v24 = vpack.c.bf16 %v870_v22, %v271_v23  ;;  %v395_v22 = vld [vmem:[#allocation6 + $0xb8] sm:$0xff]  ;;  %v418_v23 = vld [vmem:[#allocation6 + $0x170] sm:$0xff] }
 0x154   :  { %v873_v25 = vpop.f32.mrb[20].mxu0  ;;  %950 = vmatpush1.bf16.msra.mxu0 %v949_v24  ;;  %994 = vmatpush1.bf16.msra.mxu1 %v949_v24  ;;  %v394_v24 = vld [vmem:[#allocation6 + $0xb0] sm:$0xff] }
 0x155   :  { %v281_v26 = vpop.f32.mrb[21].mxu0  ;;  %951 = vmatprep.subr.bf16.mxu0 %v1111_v56  ;;  %979 = vmatprep.subr.bf16.mxu1 %v1111_v56 }
 0x156   :  { %v952_v27 = vpack.c.bf16 %v873_v25, %v281_v26  ;;  %v421_v25 = vld [vmem:[#allocation6 + $0x188] sm:$0xff]  ;;  %v420_v26 = vld [vmem:[#allocation6 + $0x180] sm:$0xff] }
 0x158   :  { %v876_v28 = vpop.f32.mrb[22].mxu0  ;;  %953 = vmatpush1.bf16.msra.mxu0 %v952_v27  ;;  %995 = vmatpush1.bf16.msra.mxu1 %v952_v27  ;;  %v423_v27 = vld [vmem:[#allocation6 + $0x198] sm:$0xff] }
 0x159   :  { %v291_v29 = vpop.f32.mrb[23].mxu0  ;;  %954 = vmatprep.subr.bf16.mxu0 %v1111_v56  ;;  %980 = vmatprep.subr.bf16.mxu1 %v1111_v56 }
 0x15a   :  { %v955_v30 = vpack.c.bf16 %v876_v28, %v291_v29  ;;  %v422_v28 = vld [vmem:[#allocation6 + $0x190] sm:$0xff]  ;;  %v425_v29 = vld [vmem:[#allocation6 + $0x1a8] sm:$0xff] }
 0x15c   :  { %v879_v31 = vpop.f32.mrb[24].mxu0  ;;  %956 = vmatpush1.bf16.msra.mxu0 %v955_v30  ;;  %996 = vmatpush1.bf16.msra.mxu1 %v955_v30  ;;  %v424_v30 = vld [vmem:[#allocation6 + $0x1a0] sm:$0xff] }
 0x15d   :  { %v301_v32 = vpop.f32.mrb[25].mxu0  ;;  %957 = vmatprep.subr.bf16.mxu0 %v1111_v56  ;;  %981 = vmatprep.subr.bf16.mxu1 %v1111_v56 }
 0x15e   :  { %v958_v33 = vpack.c.bf16 %v879_v31, %v301_v32  ;;  %v427_v31 = vld [vmem:[#allocation6 + $0x1b8] sm:$0xff]  ;;  %v426_v32 = vld [vmem:[#allocation6 + $0x1b0] sm:$0xff] }
 0x160   :  { %v882_v34 = vpop.f32.mrb[26].mxu0  ;;  %959 = vmatpush1.bf16.msra.mxu0 %v958_v33  ;;  %997 = vmatpush1.bf16.msra.mxu1 %v958_v33  ;;  %v429_v33 = vld [vmem:[#allocation6 + $0x1c8] sm:$0xff] }
 0x161   :  { %v311_v35 = vpop.f32.mrb[27].mxu0  ;;  %960 = vmatprep.subr.bf16.mxu0 %v1111_v56  ;;  %982 = vmatprep.subr.bf16.mxu1 %v1111_v56 }
 0x162   :  { %v961_v36 = vpack.c.bf16 %v882_v34, %v311_v35  ;;  %v428_v34 = vld [vmem:[#allocation6 + $0x1c0] sm:$0xff]  ;;  %v431_v35 = vld [vmem:[#allocation6 + $0x1d8] sm:$0xff] }
 0x164   :  { %v885_v37 = vpop.f32.mrb[28].mxu0  ;;  %962 = vmatpush1.bf16.msra.mxu0 %v961_v36  ;;  %998 = vmatpush1.bf16.msra.mxu1 %v961_v36  ;;  %v430_v36 = vld [vmem:[#allocation6 + $0x1d0] sm:$0xff] }
 0x165   :  { %v321_v38 = vpop.f32.mrb[29].mxu0  ;;  %963 = vmatprep.subr.bf16.mxu0 %v1111_v56  ;;  %983 = vmatprep.subr.bf16.mxu1 %v1111_v56 }
 0x166   :  { %v964_v39 = vpack.c.bf16 %v885_v37, %v321_v38  ;;  %v433_v37 = vld [vmem:[#allocation6 + $0x1e8] sm:$0xff]  ;;  %v432_v38 = vld [vmem:[#allocation6 + $0x1e0] sm:$0xff] }
 0x168   :  { %v888_v40 = vpop.f32.mrb[30].mxu0  ;;  %965 = vmatpush1.bf16.msra.mxu0 %v964_v39  ;;  %999 = vmatpush1.bf16.msra.mxu1 %v964_v39  ;;  %v435_v39 = vld [vmem:[#allocation6 + $0x1f8] sm:$0xff] }
 0x169   :  { %v331_v41 = vpop.f32.mrb[31].mxu0  ;;  %966 = vmatprep.subr.bf16.mxu0 %v1111_v56  ;;  %984 = vmatprep.subr.bf16.mxu1 %v1111_v56  ;;  %v378_v56 = vld [vmem:[#allocation6 + $0x30] sm:$0xff] }
 0x16a   :  { %v967_v42 = vpack.c.bf16 %v888_v40, %v331_v41  ;;  %v434_v40 = vld [vmem:[#allocation6 + $0x1f0] sm:$0xff] }
 0x16c   :  { %968 = vmatpush1.bf16.msra.mxu0 %v967_v42  ;;  %1000 = vmatpush1.bf16.msra.mxu1 %v967_v42 }
 0x16f   :  { %593 = vmatmul.mubr.f32.vlgmr.msra.gmra.mrb[0].mxu1 %v396_v43  ;;  %533 = vmatmul.mubr.f32.vlgmr.msra.gmra.mrb[32].mxu0 %v372_v44 }
 0x170   :  { %597 = vmatprep.mubr.f32.mxu1 %v399_v45  ;;  %537 = vmatprep.mubr.f32.mxu0 %v375_v46 }
 0x173   :  { %598 = vmatmul.mubr.f32.gmra.mrb[2].mxu1 %v398_v47  ;;  %538 = vmatmul.mubr.f32.gmra.mrb[34].mxu0 %v374_v48 }
 0x174   :  { %602 = vmatprep.mubr.f32.mxu1 %v401_v49  ;;  %542 = vmatprep.mubr.f32.mxu0 %v377_v50 }
 0x177   :  { %603 = vmatmul.mubr.f32.gmra.mrb[4].mxu1 %v400_v51  ;;  %543 = vmatmul.mubr.f32.gmra.mrb[36].mxu0 %v376_v52 }
 0x178   :  { %607 = vmatprep.mubr.f32.mxu1 %v403_v53  ;;  %547 = vmatprep.mubr.f32.mxu0 %v379_v54 }
 0x17b   :  { %608 = vmatmul.mubr.f32.gmra.mrb[6].mxu1 %v402_v55  ;;  %548 = vmatmul.mubr.f32.gmra.mrb[38].mxu0 %v378_v56 }
 0x17c   :  { %612 = vmatprep.mubr.f32.mxu1 %v405_v57  ;;  %552 = vmatprep.mubr.f32.mxu0 %v381_v58 }
 0x17f   :  { %613 = vmatmul.mubr.f32.gmra.mrb[8].mxu1 %v404_v59  ;;  %553 = vmatmul.mubr.f32.gmra.mrb[40].mxu0 %v380_v60 }
 0x180   :  { %617 = vmatprep.mubr.f32.mxu1 %v407_v61  ;;  %557 = vmatprep.mubr.f32.mxu0 %v383_v62 }
 0x183   :  { %618 = vmatmul.mubr.f32.gmra.mrb[10].mxu1 %v406_v63  ;;  %558 = vmatmul.mubr.f32.gmra.mrb[42].mxu0 %v382_v0 }
 0x184   :  { %622 = vmatprep.mubr.f32.mxu1 %v409_v1  ;;  %562 = vmatprep.mubr.f32.mxu0 %v385_v2 }
 0x187   :  { %623 = vmatmul.mubr.f32.gmra.mrb[12].mxu1 %v408_v3  ;;  %563 = vmatmul.mubr.f32.gmra.mrb[44].mxu0 %v384_v4 }
 0x188   :  { %627 = vmatprep.mubr.f32.mxu1 %v411_v5  ;;  %567 = vmatprep.mubr.f32.mxu0 %v387_v6 }
 0x18b   :  { %628 = vmatmul.mubr.f32.gmra.mrb[14].mxu1 %v410_v7  ;;  %568 = vmatmul.mubr.f32.gmra.mrb[46].mxu0 %v386_v8 }
 0x18c   :  { %632 = vmatprep.mubr.f32.mxu1 %v413_v9  ;;  %572 = vmatprep.mubr.f32.mxu0 %v389_v10 }
 0x18f   :  { %633 = vmatmul.mubr.f32.gmra.mrb[16].mxu1 %v412_v11  ;;  %573 = vmatmul.mubr.f32.gmra.mrb[48].mxu0 %v388_v12 }
 0x190   :  { %637 = vmatprep.mubr.f32.mxu1 %v415_v13  ;;  %577 = vmatprep.mubr.f32.mxu0 %v391_v14 }
 0x193   :  { %638 = vmatmul.mubr.f32.gmra.mrb[18].mxu1 %v414_v15  ;;  %578 = vmatmul.mubr.f32.gmra.mrb[50].mxu0 %v390_v16 }
 0x194   :  { %642 = vmatprep.mubr.f32.mxu1 %v417_v17  ;;  %582 = vmatprep.mubr.f32.mxu0 %v393_v18 }
 0x197   :  { %643 = vmatmul.mubr.f32.gmra.mrb[20].mxu1 %v416_v19  ;;  %583 = vmatmul.mubr.f32.gmra.mrb[52].mxu0 %v392_v20 }
 0x198   :  { %647 = vmatprep.mubr.f32.mxu1 %v419_v21  ;;  %587 = vmatprep.mubr.f32.mxu0 %v395_v22 }
 0x19b   :  { %648 = vmatmul.mubr.f32.gmra.mrb[22].mxu1 %v418_v23  ;;  %588 = vmatmul.mubr.f32.gmra.mrb[54].mxu0 %v394_v24 }
 0x19c   :  { %652 = vmatprep.mubr.f32.mxu1 %v421_v25 }
 0x19f   :  { %653 = vmatmul.mubr.f32.gmra.mrb[24].mxu1 %v420_v26 }
 0x1a0   :  { %657 = vmatprep.mubr.f32.mxu1 %v423_v27 }
 0x1a3   :  { %658 = vmatmul.mubr.f32.gmra.mrb[26].mxu1 %v422_v28 }
 0x1a4   :  { %662 = vmatprep.mubr.f32.mxu1 %v425_v29 }
 0x1a7   :  { %663 = vmatmul.mubr.f32.gmra.mrb[28].mxu1 %v424_v30 }
 0x1a8   :  { %667 = vmatprep.mubr.f32.mxu1 %v427_v31 }
 0x1ab   :  { %668 = vmatmul.mubr.f32.gmra.mrb[30].mxu1 %v426_v32 }
 0x1ac   :  { %672 = vmatprep.mubr.f32.mxu1 %v429_v33 }
 0x1af   :  { %673 = vmatmul.mubr.f32.gmra.mrb[32].mxu1 %v428_v34 }
 0x1b0   :  { %677 = vmatprep.mubr.f32.mxu1 %v431_v35 }
 0x1b3   :  { %678 = vmatmul.mubr.f32.gmra.mrb[34].mxu1 %v430_v36 }
 0x1b4   :  { %682 = vmatprep.mubr.f32.mxu1 %v433_v37 }
 0x1b7   :  { %683 = vmatmul.mubr.f32.gmra.mrb[36].mxu1 %v432_v38 }
 0x1b8   :  { %687 = vmatprep.mubr.f32.mxu1 %v435_v39 }
 0x1bb   :  { %688 = vmatmul.mubr.f32.gmra.mrb[38].mxu1 %v434_v40 }
 0x242   :  { %v594_v41 = vpop.f32.mrb[0].mxu1  ;;  %v534_v42 = vpop.f32.mrb[32].mxu0 }
 0x243   :  { %705 = vst [vmem:[#allocation9 + $0x60] sm:$0xff] %v594_v41  ;;  %v596_v43 = vpop.f32.mrb[1].mxu1  ;;  %693 = vst [vmem:[#allocation9] sm:$0xff] %v534_v42  ;;  %v536_v44 = vpop.f32.mrb[33].mxu0 }
 0x246   :  { %v599_v45 = vpop.f32.mrb[2].mxu1  ;;  %v539_v46 = vpop.f32.mrb[34].mxu0 }
 0x247   :  { %706 = vst [vmem:[#allocation9 + $0x68] sm:$0xff] %v599_v45  ;;  %v601_v47 = vpop.f32.mrb[3].mxu1  ;;  %694 = vst [vmem:[#allocation9 + $0x8] sm:$0xff] %v539_v46  ;;  %v541_v48 = vpop.f32.mrb[35].mxu0 }
 0x24a   :  { %v604_v49 = vpop.f32.mrb[4].mxu1  ;;  %v544_v50 = vpop.f32.mrb[36].mxu0 }
 0x24b   :  { %707 = vst [vmem:[#allocation9 + $0x70] sm:$0xff] %v604_v49  ;;  %v606_v51 = vpop.f32.mrb[5].mxu1  ;;  %695 = vst [vmem:[#allocation9 + $0x10] sm:$0xff] %v544_v50  ;;  %v546_v52 = vpop.f32.mrb[37].mxu0 }
 0x24e   :  { %v609_v53 = vpop.f32.mrb[6].mxu1  ;;  %v549_v54 = vpop.f32.mrb[38].mxu0 }
 0x24f   :  { %708 = vst [vmem:[#allocation9 + $0x78] sm:$0xff] %v609_v53  ;;  %v611_v55 = vpop.f32.mrb[7].mxu1  ;;  %696 = vst [vmem:[#allocation9 + $0x18] sm:$0xff] %v549_v54  ;;  %v551_v56 = vpop.f32.mrb[39].mxu0 }
 0x252   :  { %v614_v57 = vpop.f32.mrb[8].mxu1  ;;  %v554_v58 = vpop.f32.mrb[40].mxu0 }
 0x253   :  { %709 = vst [vmem:[#allocation9 + $0x80] sm:$0xff] %v614_v57  ;;  %v616_v59 = vpop.f32.mrb[9].mxu1  ;;  %697 = vst [vmem:[#allocation9 + $0x20] sm:$0xff] %v554_v58  ;;  %v556_v60 = vpop.f32.mrb[41].mxu0 }
 0x256   :  { %v619_v61 = vpop.f32.mrb[10].mxu1  ;;  %v559_v62 = vpop.f32.mrb[42].mxu0 }
 0x257   :  { %710 = vst [vmem:[#allocation9 + $0x88] sm:$0xff] %v619_v61  ;;  %v621_v63 = vpop.f32.mrb[11].mxu1  ;;  %698 = vst [vmem:[#allocation9 + $0x28] sm:$0xff] %v559_v62  ;;  %v561_v0 = vpop.f32.mrb[43].mxu0 }
 0x25a   :  { %v624_v1 = vpop.f32.mrb[12].mxu1  ;;  %v564_v2 = vpop.f32.mrb[44].mxu0 }
 0x25b   :  { %711 = vst [vmem:[#allocation9 + $0x90] sm:$0xff] %v624_v1  ;;  %v626_v3 = vpop.f32.mrb[13].mxu1  ;;  %699 = vst [vmem:[#allocation9 + $0x30] sm:$0xff] %v564_v2  ;;  %v566_v4 = vpop.f32.mrb[45].mxu0 }
 0x25e   :  { %v629_v5 = vpop.f32.mrb[14].mxu1  ;;  %v569_v6 = vpop.f32.mrb[46].mxu0 }
 0x25f   :  { %712 = vst [vmem:[#allocation9 + $0x98] sm:$0xff] %v629_v5  ;;  %v631_v7 = vpop.f32.mrb[15].mxu1  ;;  %700 = vst [vmem:[#allocation9 + $0x38] sm:$0xff] %v569_v6  ;;  %v571_v8 = vpop.f32.mrb[47].mxu0 }
 0x262   :  { %v634_v9 = vpop.f32.mrb[16].mxu1  ;;  %v574_v10 = vpop.f32.mrb[48].mxu0 }
 0x263   :  { %713 = vst [vmem:[#allocation9 + $0xa0] sm:$0xff] %v634_v9  ;;  %v636_v11 = vpop.f32.mrb[17].mxu1  ;;  %701 = vst [vmem:[#allocation9 + $0x40] sm:$0xff] %v574_v10  ;;  %v576_v12 = vpop.f32.mrb[49].mxu0 }
 0x266   :  { %v639_v13 = vpop.f32.mrb[18].mxu1  ;;  %v579_v14 = vpop.f32.mrb[50].mxu0 }
 0x267   :  { %714 = vst [vmem:[#allocation9 + $0xa8] sm:$0xff] %v639_v13  ;;  %v641_v15 = vpop.f32.mrb[19].mxu1  ;;  %702 = vst [vmem:[#allocation9 + $0x48] sm:$0xff] %v579_v14  ;;  %v581_v16 = vpop.f32.mrb[51].mxu0 }
 0x26a   :  { %v644_v17 = vpop.f32.mrb[20].mxu1  ;;  %v584_v18 = vpop.f32.mrb[52].mxu0 }
 0x26b   :  { %715 = vst [vmem:[#allocation9 + $0xb0] sm:$0xff] %v644_v17  ;;  %v646_v19 = vpop.f32.mrb[21].mxu1  ;;  %703 = vst [vmem:[#allocation9 + $0x50] sm:$0xff] %v584_v18  ;;  %v586_v20 = vpop.f32.mrb[53].mxu0 }
 0x26e   :  { %v649_v21 = vpop.f32.mrb[22].mxu1  ;;  %v589_v22 = vpop.f32.mrb[54].mxu0 }
 0x26f   :  { %716 = vst [vmem:[#allocation9 + $0xb8] sm:$0xff] %v649_v21  ;;  %v651_v23 = vpop.f32.mrb[23].mxu1  ;;  %704 = vst [vmem:[#allocation9 + $0x58] sm:$0xff] %v589_v22  ;;  %v591_v24 = vpop.f32.mrb[55].mxu0 }
 0x272   :  { %v654_v25 = vpop.f32.mrb[24].mxu1 }
 0x273   :  { %717 = vst [vmem:[#allocation9 + $0xc0] sm:$0xff] %v654_v25  ;;  %v656_v26 = vpop.f32.mrb[25].mxu1 }
 0x276   :  { %v659_v27 = vpop.f32.mrb[26].mxu1 }
 0x277   :  { %718 = vst [vmem:[#allocation9 + $0xc8] sm:$0xff] %v659_v27  ;;  %v661_v28 = vpop.f32.mrb[27].mxu1 }
 0x27a   :  { %v664_v29 = vpop.f32.mrb[28].mxu1 }
 0x27b   :  { %719 = vst [vmem:[#allocation9 + $0xd0] sm:$0xff] %v664_v29  ;;  %v666_v30 = vpop.f32.mrb[29].mxu1 }
 0x27e   :  { %v669_v31 = vpop.f32.mrb[30].mxu1 }
 0x27f   :  { %720 = vst [vmem:[#allocation9 + $0xd8] sm:$0xff] %v669_v31  ;;  %v671_v32 = vpop.f32.mrb[31].mxu1 }
 0x282   :  { %v674_v33 = vpop.f32.mrb[32].mxu1 }
 0x283   :  { %721 = vst [vmem:[#allocation9 + $0xe0] sm:$0xff] %v674_v33  ;;  %v676_v34 = vpop.f32.mrb[33].mxu1 }
 0x286   :  { %v679_v35 = vpop.f32.mrb[34].mxu1 }
 0x287   :  { %722 = vst [vmem:[#allocation9 + $0xe8] sm:$0xff] %v679_v35  ;;  %v681_v36 = vpop.f32.mrb[35].mxu1 }
 0x28a   :  { %v684_v37 = vpop.f32.mrb[36].mxu1 }
 0x28b   :  { %723 = vst [vmem:[#allocation9 + $0xf0] sm:$0xff] %v684_v37  ;;  %v686_v38 = vpop.f32.mrb[37].mxu1 }
 0x28e   :  { %v689_v39 = vpop.f32.mrb[38].mxu1 }
 0x28f   :  { %724 = vst [vmem:[#allocation9 + $0xf8] sm:$0xff] %v689_v39  ;;  %v691_v40 = vpop.f32.mrb[39].mxu1 }
 0x290   :  { %1087 = shalt.err (!%p1084_p0)
}
 0x291   :  { %s1088_s25 = scalar_lea.hbm %s1218_s3, 4096 }
 0x292   :  { %p1089_p1 = scmp.ne.s32.totalorder %s1218_s3, %s1088_s25  ;;  %p1092_p2 = scmp.lt.u32.totalorder %s1088_s25, %s1218_s3 }
 0x294   :  { %p1094_p3 = pnand %p1092_p2, %p1089_p1 }
 0x296   :  { %1097 = shalt.err (!%p1094_p3)
}
 0x297   :  { %s1113_s30 = smov 128   ;;  %s1114_s4 = smov 8  }
 0x298   :  { %740 = dma.vmem_to_hbm [thread:$0]  %s735_s21, 4096, %s1218_s3, [#allocation8], %s1113_s30, %s1113_s30, %s1114_s4  }
 0x299   :  { %1104 = dma.done.wait [#allocation8], 4096  }
 0x29a   :  { %1105 = vsyncadd [#allocation8], 4294963200 }
 0x29b   :  { %744 = vsyncpa [#allocation7], 1 }
 0x29c   :  { %745 = vsyncpa [#allocation8], 1 }
 0x29d   :  { %746 = vsyncmov [#allocation5] }
 0x2a0   :  { %s747_s7 = vpop.sfrf %746 }
 0x2a1   :  { %p759_p4 = scmp.ne.s32.totalorder %s747_s7, 0 }
 0x2a3   :  { %751 = shalt.err (%p759_p4)  }
 0x2a4   :  { %753 = vsyncmov [#allocation5 + $0x1] }
 0x2a7   :  { %s754_s8 = vpop.sfrf %753 }
 0x2a8   :  { %p760_p5 = scmp.ne.s32.totalorder %s754_s8, 0 }
 0x2aa   :  { %758 = shalt.err (%p760_p5)  }

</bundles_post_ra>
